<compile_context>
chip_gen: v7x
topology: tpu7x:2x2x1
jax: 0.10.0
libtpu: 0.0.40
codegen_flags: <defaults>
</compile_context>

<pallas_src>
import functools

import jax
import jax.numpy as jnp
from jax import lax
from jax.experimental import pallas as pl
from jax.experimental.pallas import tpu as pltpu

DEFAULT_LAYER_NORM_EPS = 1e-05


# ----------------------------------------------------------------------------
# Per-generation sizing
# ----------------------------------------------------------------------------
def _device_kind() -> str:
    try:
        return jax.devices()[0].device_kind.lower()
    except Exception:
        return ""


_IS_V7X = "v7" in _device_kind()


def _vmem_capacity_bytes() -> int:
    try:
        info = pltpu.get_tpu_info()
        cap = int(getattr(info, "vmem_capacity_bytes", 0) or 0)
        if cap > 0:
            return cap
    except Exception:
        pass
    # Fallback by device kind: v7x has 64 MiB / TC, v5e/v6e have 128 MiB.
    return (64 if _IS_V7X else 128) * 1024 * 1024


_VMEM_CAPACITY = _vmem_capacity_bytes()
# ~75% of physical, capped at 100 MiB: v5e/v6e -> 96 MiB, v7x -> 48 MiB.
_VMEM_LIMIT_BYTES = min((_VMEM_CAPACITY * 3) // 4, 100 * 1024 * 1024)


def _min_rows(dtype) -> int:
    """Minimum sublane granularity for the row-tile, by element width."""
    itemsize = jnp.dtype(dtype).itemsize
    return {4: 8, 2: 16, 1: 32}.get(itemsize, 8)


def _fused_fits(S, D, itemsize) -> bool:
    """Whole-(S, D) slab per grid step: double-buffered in + out blocks plus
    ~3 f32 slab-sized temporaries must fit the scoped VMEM budget."""
    io_slab = S * D * itemsize
    f32_slab = S * D * 4
    need = 4 * io_slab + 3 * f32_slab
    return need <= _VMEM_LIMIT_BYTES


def _choose_s_tile(S, D, min_rows) -> int:
    """Row tile for the two-pass path.  Working-set budget ~ vmem_limit/12
    (covers 2x(in)+2x(out) buffering, f32 temporaries, mean/gamma/beta)."""
    tile_budget = max(_VMEM_LIMIT_BYTES // 12, min_rows * D * 4)
    per_row_f32 = D * 4
    max_rows = max(min_rows, tile_budget // per_row_f32)
    tS = (min(max_rows, S) // min_rows) * min_rows
    tS = max(tS, min(S, min_rows))
    if tS >= S:
        return S
    return tS


# ----------------------------------------------------------------------------
# Kernels
# ----------------------------------------------------------------------------
def _fused_kernel(x_ref, gamma_ref, beta_ref, o_ref, *, eps):
    """One batch element per step; x_ref is (S, D) (batch dim squeezed)."""
    x = x_ref[...].astype(jnp.float32)                        # (S, D)
    S, D = x.shape

    # mean over the sequence axis (sublane reduce) -> (1, D)
    xmean = jnp.sum(x, axis=0, keepdims=True) * (1.0 / S)

    # unbiased variance over the hidden axis (lane reduce) -> (S, 1)
    row_mean = jnp.sum(x, axis=1, keepdims=True) * (1.0 / D)
    diff = x - row_mean
    xvar = jnp.sum(diff * diff, axis=1, keepdims=True) * (1.0 / (D - 1))
    inv = lax.rsqrt(xvar + eps)                               # EUP, (S, 1)

    xhat = (x - xmean) * inv
    o_ref[...] = (gamma_ref[...] * xhat + beta_ref[...]).astype(o_ref.dtype)


def _mean_kernel(x_ref, mean_ref, *, inv_s, valid_s, needs_mask):
    """Accumulate the sequence-axis mean.  x_ref: (tS, D); mean_ref: (1, D) f32,
    resident across the (last, 'arbitrary') S grid axis."""
    s = pl.program_id(1)

    @pl.when(s == 0)
    def _():
        mean_ref[...] = jnp.zeros_like(mean_ref)

    x = x_ref[...].astype(jnp.float32)                        # (tS, D)
    if needs_mask:
        tS = x.shape[0]
        row = s * tS + lax.broadcasted_iota(jnp.int32, (tS, 1), 0)
        x = jnp.where(row < valid_s, x, 0.0)                  # mask padded rows
    mean_ref[...] += jnp.sum(x, axis=0, keepdims=True)

    @pl.when(s == pl.num_programs(1) - 1)
    def _():
        mean_ref[...] = mean_ref[...] * inv_s


def _norm_kernel(x_ref, mean_ref, gamma_ref, beta_ref, o_ref, *, eps):
    """Normalize one (tS, D) tile; mean_ref is the precomputed (1, D) seq-mean.
    Rows of a partial boundary tile compute garbage but the out-of-bounds part
    of the output block is clipped on writeback."""
    x = x_ref[...].astype(jnp.float32)                        # (tS, D)
    D = x.shape[1]

    row_mean = jnp.sum(x, axis=1, keepdims=True) * (1.0 / D)  # (tS, 1)
    diff = x - row_mean
    xvar = jnp.sum(diff * diff, axis=1, keepdims=True) * (1.0 / (D - 1))
    inv = lax.rsqrt(xvar + eps)                               # (tS, 1), EUP

    xhat = (x - mean_ref[...]) * inv
    o_ref[...] = (gamma_ref[...] * xhat + beta_ref[...]).astype(o_ref.dtype)


# ----------------------------------------------------------------------------
# Wrapper
# ----------------------------------------------------------------------------
def layer_normalization(x, gamma, beta, eps=DEFAULT_LAYER_NORM_EPS, s_tile=None):
    """x: (B, S, D); gamma, beta: (D,)."""
    B, S, D = x.shape
    assert D > 1, "unbiased (ddof=1) variance over the last axis requires D > 1"

    itemsize = jnp.dtype(x.dtype).itemsize
    min_rows = _min_rows(x.dtype)

    gamma_r = gamma.reshape(1, D).astype(jnp.float32)
    beta_r = beta.reshape(1, D).astype(jnp.float32)

    if s_tile is None:
        tS = _choose_s_tile(S, D, min_rows)
    else:
        assert s_tile == S or s_tile % min_rows == 0, (
            f"s_tile must equal S or be a multiple of {min_rows} for dtype {x.dtype}")
        tS = min(s_tile, S)

    use_fused = (s_tile is None or tS >= S) and _fused_fits(S, D, itemsize)

    # v7x: with tiny batch the fused grid=(B,) starves one of the two
    # TensorCores; prefer the (B, nS) both-parallel two-pass layout instead.
    if use_fused and _IS_V7X and B < 4 and pl.cdiv(S, max(tS, 1)) >= 2 and tS < S:
        use_fused = False

    if use_fused:
        # ------- single-pass fused kernel: whole (S, D) slab per batch element
        return pl.pallas_call(
            functools.partial(_fused_kernel, eps=eps),
            out_shape=jax.ShapeDtypeStruct((B, S, D), x.dtype),
            grid_spec=pltpu.PrefetchScalarGridSpec(
                num_scalar_prefetch=0,
                grid=(B,),
                in_specs=[
                    pl.BlockSpec((pl.Squeezed(), S, D), lambda b: (b, 0, 0)),
                    pl.BlockSpec((1, D), lambda b: (0, 0)),
                    pl.BlockSpec((1, D), lambda b: (0, 0)),
                ],
                out_specs=pl.BlockSpec((pl.Squeezed(), S, D), lambda b: (b, 0, 0)),
            ),
            compiler_params=pltpu.CompilerParams(
                dimension_semantics=("parallel",),
                vmem_limit_bytes=_VMEM_LIMIT_BYTES,
            ),
        )(x, gamma_r, beta_r)

    # ------- two-pass, S-tiled layout (cdiv grid; partial last tile allowed)
    nS = pl.cdiv(S, tS)
    needs_mask = (S % tS) != 0

    # Pass 1: per-(batch, hidden) mean over the sequence axis -> (B, 1, D) f32.
    mean = pl.pallas_call(
        functools.partial(_mean_kernel, inv_s=1.0 / S, valid_s=S,
                          needs_mask=needs_mask),
        out_shape=jax.ShapeDtypeStruct((B, 1, D), jnp.float32),
        grid_spec=pltpu.PrefetchScalarGridSpec(
            num_scalar_prefetch=0,
            grid=(B, nS),
            in_specs=[pl.BlockSpec((pl.Squeezed(), tS, D), lambda b, s: (b, s, 0))],
            out_specs=pl.BlockSpec((pl.Squeezed(), 1, D), lambda b, s: (b, 0, 0)),
        ),
        compiler_params=pltpu.CompilerParams(
            dimension_semantics=("parallel", "arbitrary"),
            vmem_limit_bytes=_VMEM_LIMIT_BYTES,
        ),
    )(x)

    # Pass 2: normalize on (tS, D) tiles; both grid axes independent.
    return pl.pallas_call(
        functools.partial(_norm_kernel, eps=eps),
        out_shape=jax.ShapeDtypeStruct((B, S, D), x.dtype),
        grid_spec=pltpu.PrefetchScalarGridSpec(
            num_scalar_prefetch=0,
            grid=(B, nS),
            in_specs=[
                pl.BlockSpec((pl.Squeezed(), tS, D), lambda b, s: (b, s, 0)),
                pl.BlockSpec((pl.Squeezed(), 1, D), lambda b, s: (b, 0, 0)),
                pl.BlockSpec((1, D), lambda b, s: (0, 0)),
                pl.BlockSpec((1, D), lambda b, s: (0, 0)),
            ],
            out_specs=pl.BlockSpec((pl.Squeezed(), tS, D), lambda b, s: (b, s, 0)),
        ),
        compiler_params=pltpu.CompilerParams(
            dimension_semantics=("parallel", "parallel"),
            vmem_limit_bytes=_VMEM_LIMIT_BYTES,
        ),
    )(x, mean, gamma_r, beta_r)


# ----------------------------------------------------------------------------
# Reference + test
# ----------------------------------------------------------------------------
def _reference(x, gamma, beta, eps=DEFAULT_LAYER_NORM_EPS):
    x32 = x.astype(jnp.float32)
    xmean = jnp.mean(x32, axis=1, keepdims=True)
    xvar = jnp.var(x32, axis=2, keepdims=True, ddof=1)
    xhat = (x32 - xmean) / jnp.sqrt(xvar + eps)
    return (gamma.reshape(1, 1, -1) * xhat + beta.reshape(1, 1, -1)).astype(x.dtype)


if __name__ == "__main__":
    key = jax.random.PRNGKey(0)
    k1, k2, k3 = jax.random.split(key, 3)

    # Case 1: small shape -> fused single-pass path (or two-pass on v7x B<4).
    B, S, D = 2, 8, 32
    x = jax.random.normal(k1, (B, S, D), dtype=jnp.float32)
    gamma = jnp.ones((D,), dtype=jnp.float32)   # matches torch.ones(dim)
    beta = jnp.zeros((D,), dtype=jnp.float32)   # matches torch.zeros(dim)

    out = jax.block_until_ready(layer_normalization(x, gamma, beta))
    ref = _reference(x, gamma, beta)
    assert jnp.allclose(out, ref, atol=1e-5, rtol=1e-5), "fused path mismatch"

    # Case 2: force the S-tiled two-pass path (tS=8 over S=32, exact tiling).
    B2, S2, D2 = 2, 32, 32
    x2 = jax.random.normal(k2, (B2, S2, D2), dtype=jnp.float32)
    g2 = jnp.ones((D2,), dtype=jnp.float32)
    b2 = jnp.zeros((D2,), dtype=jnp.float32)

    out2 = jax.block_until_ready(layer_normalization(x2, g2, b2, s_tile=8))
    ref2 = _reference(x2, g2, b2)
    assert jnp.allclose(out2, ref2, atol=1e-5, rtol=1e-5), "tiled path mismatch"

    # Case 3: awkward S (partial last tile: S=20, tS=8 -> 3 tiles, last masked).
    B3, S3, D3 = 2, 20, 128
    x3 = jax.random.normal(k3, (B3, S3, D3), dtype=jnp.float32)
    g3 = jnp.ones((D3,), dtype=jnp.float32)
    b3 = jnp.zeros((D3,), dtype=jnp.float32)

    out3 = jax.block_until_ready(layer_normalization(x3, g3, b3, s_tile=8))
    ref3 = _reference(x3, g3, b3)
    assert jnp.allclose(out3, ref3, atol=1e-5, rtol=1e-5), "remainder path mismatch"

    print("KERNEL_OK")
</pallas_src>

<mosaic_0001>
module attributes {stable_mosaic.version = 11 : i64} {
  func.func @_fused_kernel(%arg0: i32, %arg1: memref<1x8x32xf32, #tpu.memory_space<vmem>>, %arg2: memref<1x32xf32, #tpu.memory_space<vmem>>, %arg3: memref<1x32xf32, #tpu.memory_space<vmem>>, %arg4: memref<1x8x32xf32, #tpu.memory_space<vmem>>) attributes {dimension_semantics = [#tpu.dimension_semantics<parallel>], iteration_bounds = array<i64: 2>, scalar_prefetch = 0 : i64, scratch_operands = 0 : i64, tpu.core_type = #tpu.core_type<tc>, window_params = [{transform_indices = @transform_0, window_bounds = array<i64: 1, 8, 32>}, {pipeline_mode = #tpu.pipeline_mode<synchronous>, transform_indices = @transform_1, window_bounds = array<i64: 1, 32>}, {pipeline_mode = #tpu.pipeline_mode<synchronous>, transform_indices = @transform_2, window_bounds = array<i64: 1, 32>}, {transform_indices = @transform_3, window_bounds = array<i64: 1, 8, 32>}]} {
    %c0 = arith.constant 0 : index
    %c0_0 = arith.constant 0 : index
    %c0_1 = arith.constant 0 : index
    %0 = vector.load %arg1[%c0, %c0_0, %c0_1] : memref<1x8x32xf32, #tpu.memory_space<vmem>>, vector<1x8x32xf32>
    %1 = vector.shape_cast %0 : vector<1x8x32xf32> to vector<8x32xf32>
    %cst = arith.constant dense<0.000000e+00> : vector<32xf32>
    %2 = vector.multi_reduction <add>, %1, %cst [0] : vector<8x32xf32> to vector<32xf32>
    %3 = vector.shape_cast %2 : vector<32xf32> to vector<1x32xf32>
    %cst_2 = arith.constant 1.250000e-01 : f32
    %4 = vector.broadcast %cst_2 : f32 to vector<1x32xf32>
    %5 = arith.mulf %3, %4 : vector<1x32xf32>
    %cst_3 = arith.constant dense<0.000000e+00> : vector<8xf32>
    %6 = vector.multi_reduction <add>, %1, %cst_3 [1] : vector<8x32xf32> to vector<8xf32>
    %7 = vector.shape_cast %6 : vector<8xf32> to vector<8x1xf32>
    %cst_4 = arith.constant 3.125000e-02 : f32
    %8 = vector.broadcast %cst_4 : f32 to vector<8x1xf32>
    %9 = arith.mulf %7, %8 : vector<8x1xf32>
    %10 = vector.broadcast %9 : vector<8x1xf32> to vector<8x32xf32>
    %11 = arith.subf %1, %10 : vector<8x32xf32>
    %12 = arith.mulf %11, %11 : vector<8x32xf32>
    %cst_5 = arith.constant dense<0.000000e+00> : vector<8xf32>
    %13 = vector.multi_reduction <add>, %12, %cst_5 [1] : vector<8x32xf32> to vector<8xf32>
    %14 = vector.shape_cast %13 : vector<8xf32> to vector<8x1xf32>
    %cst_6 = arith.constant 0.0322580636 : f32
    %15 = vector.broadcast %cst_6 : f32 to vector<8x1xf32>
    %16 = arith.mulf %14, %15 : vector<8x1xf32>
    %cst_7 = arith.constant 9.99999974E-6 : f32
    %17 = vector.broadcast %cst_7 : f32 to vector<8x1xf32>
    %18 = arith.addf %16, %17 : vector<8x1xf32>
    %19 = math.rsqrt %18 : vector<8x1xf32>
    %20 = vector.broadcast %5 : vector<1x32xf32> to vector<8x32xf32>
    %21 = arith.subf %1, %20 : vector<8x32xf32>
    %22 = vector.broadcast %19 : vector<8x1xf32> to vector<8x32xf32>
    %23 = arith.mulf %21, %22 : vector<8x32xf32>
    %c0_8 = arith.constant 0 : index
    %c0_9 = arith.constant 0 : index
    %24 = vector.load %arg2[%c0_8, %c0_9] : memref<1x32xf32, #tpu.memory_space<vmem>>, vector<1x32xf32>
    %25 = vector.broadcast %24 : vector<1x32xf32> to vector<8x32xf32>
    %26 = arith.mulf %25, %23 : vector<8x32xf32>
    %c0_10 = arith.constant 0 : index
    %c0_11 = arith.constant 0 : index
    %27 = vector.load %arg3[%c0_10, %c0_11] : memref<1x32xf32, #tpu.memory_space<vmem>>, vector<1x32xf32>
    %28 = vector.broadcast %27 : vector<1x32xf32> to vector<8x32xf32>
    %29 = arith.addf %26, %28 : vector<8x32xf32>
    %c0_12 = arith.constant 0 : index
    %c0_13 = arith.constant 0 : index
    %c0_14 = arith.constant 0 : index
    %30 = vector.load %arg4[%c0_12, %c0_13, %c0_14] : memref<1x8x32xf32, #tpu.memory_space<vmem>>, vector<1x8x32xf32>
    %31 = vector.shape_cast %30 : vector<1x8x32xf32> to vector<8x32xf32>
    %32 = vector.shape_cast %29 : vector<8x32xf32> to vector<1x8x32xf32>
    tpu.vector_store %arg4[%c0_12, %c0_13, %c0_14], %32 {strides = array<i32>} : memref<1x8x32xf32, #tpu.memory_space<vmem>>, vector<1x8x32xf32>,
    return
  }
  func.func @transform_0(%arg0: i32) -> (i32, i32, i32) {
    %c0_i32 = arith.constant 0 : i32
    %c0_i32_0 = arith.constant 0 : i32
    %c0_i32_1 = arith.constant 0 : i32
    return %arg0, %c0_i32, %c0_i32_0 : i32, i32, i32
  }
  func.func @transform_1(%arg0: i32) -> (i32, i32) {
    %c0_i32 = arith.constant 0 : i32
    %c0_i32_0 = arith.constant 0 : i32
    %c0_i32_1 = arith.constant 0 : i32
    return %c0_i32, %c0_i32_0 : i32, i32
  }
  func.func @transform_2(%arg0: i32) -> (i32, i32) {
    %c0_i32 = arith.constant 0 : i32
    %c0_i32_0 = arith.constant 0 : i32
    %c0_i32_1 = arith.constant 0 : i32
    return %c0_i32, %c0_i32_0 : i32, i32
  }
  func.func @transform_3(%arg0: i32) -> (i32, i32, i32) {
    %c0_i32 = arith.constant 0 : i32
    %c0_i32_0 = arith.constant 0 : i32
    %c0_i32_1 = arith.constant 0 : i32
    return %arg0, %c0_i32, %c0_i32_0 : i32, i32, i32
  }
}

</mosaic_0001>

<bundles_post_ra>
// kernel: tpu_custom_call.1
= control target key start
LH: loop header
LB: loop body
LE: loop exit
PB: predicated region body
PF: predicated region fallthrough
CT: control target
= control target key end

     0   :  { %8 = vsyncpa [#allocation3], 0  ;;  %s856_s0 = inlined_call_operand.hbm [shape: f32[2,8,32], index: 0, kind: input, shape index: {}]   ;;  %s857_s1 = inlined_call_operand.hbm [shape: f32[1,32], index: 1, kind: input, shape index: {}]   ;;  %s858_s2 = inlined_call_operand.hbm [shape: f32[1,32], index: 2, kind: input, shape index: {}]   ;;  %s859_s3 = inlined_call_operand.hbm [shape: f32[2,8,32], index: 3, kind: output, shape index: {}]  }
   0x1   :  { %10 = vsyncpa [#allocation3 + $0x1], 0 }
   0x2   :  { %11 = vsyncpa [#allocation6], 0 }
   0x3   :  { %12 = vsyncpa [#allocation4], 0 }
   0x4   :  { %14 = vsyncpa [#allocation4 + $0x1], 0  ;;  %s623_s12 = smov 0   ;;  %s625_s13 = smov 0  }
   0x5   :  { %s627_s14 = smov 0   ;;  %s629_s15 = smov 0  }
   0x6 LB: > { %s644_s16 = sadd.s32 4294967295, %s597_s15   ;;  %s354_s17 = sadd.s32 4294967294, %s597_s15   ;;  %s597_s15 = sphi %s629_s15, %s879_s15   ;;  %s593_s14 = sphi %s627_s14, %s878_s14   ;;  %s589_s13 = sphi %s625_s13, %s877_s13   ;;  %s585_s12 = sphi %s623_s12, %s876_s12  }
   0x7   : > { %p40_p0 = scmp.ne.s32.totalorder %s589_s13, %s585_s12  ;;  %p860_p1 = scmp.eq.s32.totalorder %s644_s16, 0 }
   0x8   : > { %p112_p3 = scmp.eq.s32.totalorder %s354_s17, 1  ;;  %p355_p5 = scmp.ge.s32.totalorder %s597_s15, 1 }
   0x9   : > { %p653_p4 = por %p860_p1, %p40_p0  ;;  %p119_p7 = scmp.lt.s32.totalorder %s597_s15, 3 }
   0xa   : > { %p658_p6 = por %p112_p3, %p40_p0  ;;  %s599_s21 = smov [#allocation5]  }
   0xb   : > { %s863_s18 = scalar_select %p653_p4, 1, 0 }
   0xc   : > { %s864_s19 = scalar_select %p658_p6, 1, 0 }
   0xd   : > { %p663_p8 = pnand %p355_p5, %p119_p7  ;;  %s132_s22 = sshll.u32 %s599_s21, 4  ;;  %s133_s22 = int_to_ptr.vmem [resolvable:$true] %s132_s22 }
   0xe   : > { %s600_s23 = smov [#allocation7]   ;;  %s679_s26 = sadd.s32 1, %s597_s15  }
   0xf   : > { %s865_s20 = scalar_select %p663_p8, 1, 0 }
  0x10   : > { %p384_p10 = pneg %p663_p8  ;;  %s143_s24 = sshll.u32 %s600_s23, 4  ;;  %s676_s24 = int_to_ptr.vmem [resolvable:$true] %s143_s24 }
  0x11   : > { %s24_s27 = ssub.s32 %s597_s15, %s679_s26  ;;  %s441_s30 = scalar_lea.hbm %s857_s1, 16 }
  0x12   : > { %p672_p11 = pnand %p384_p10, %p860_p1  ;;  %p442_p12 = scmp.ne.s32.totalorder %s857_s1, %s441_s30 }
  0x13   : > { %p448_p5 = scmp.lt.u32.totalorder %s441_s30, %s857_s1 }
  0x14   : > { %p443_p13 = pneg %p672_p11 }
  0x16   : > { %p444_p0 = pnand %p443_p13, %p442_p12 }
  0x18   : > { %p445_p3 = pneg %p444_p0 }
  0x1a   : > { %p450_p7 = pnand %p448_p5, %p445_p3 }
  0x1c   : > { %453 = shalt.err (!%p450_p7)
}
  0x1d   : > { %s454_s8 = scalar_lea.vmem %s133_s22, 16  ;;  %s461_s9 = scalar_lea.vmem %s133_s22, 32 }
  0x1e   : > { %p455_p10 = scmp.ne.s32.totalorder %s133_s22, %s454_s8  ;;  %p462_p2 = scmp.lt.s32.totalorder %s133_s22, %s133_s22 }
  0x1f   : > { %p463_p6 = scmp.lt.s32.totalorder %s461_s9, %s454_s8 }
  0x20   : > { %p457_p9 = pnand %p455_p10, %p443_p13 }
  0x21   : > { %p464_p4 = por %p463_p6, %p462_p2 }
  0x22   : > { %p458_p1 = pneg %p457_p9 }
  0x24   : > { %p465_p8 = pnand %p464_p4, %p458_p1 }
  0x26   : > { %468 = shalt.err (!%p465_p8)
}
  0x27   : > { %387 = dma.hbm_to_vmem [thread:$0]  (!%p672_p11), %s857_s1, 16, %s133_s22, [#allocation6]  }
  0x28   : > { %s469_s23 = scalar_lea.hbm %s858_s2, 16 }
  0x29   : > { %p470_p9 = scmp.ne.s32.totalorder %s858_s2, %s469_s23  ;;  %p476_p4 = scmp.lt.u32.totalorder %s469_s23, %s858_s2 }
  0x2b   : > { %p472_p2 = pnand %p470_p9, %p443_p13 }
  0x2d   : > { %p473_p1 = pneg %p472_p2 }
  0x2f   : > { %p478_p6 = pnand %p476_p4, %p473_p1 }
  0x31   : > { %481 = shalt.err (!%p478_p6)
}
  0x32   : > { %s482_s22 = scalar_lea.vmem %s676_s24, 16  ;;  %s489_s5 = scalar_lea.vmem %s676_s24, 32 }
  0x33   : > { %p483_p8 = scmp.ne.s32.totalorder %s676_s24, %s482_s22  ;;  %p490_p3 = scmp.lt.s32.totalorder %s676_s24, %s676_s24 }
  0x34   : > { %p491_p5 = scmp.lt.s32.totalorder %s489_s5, %s482_s22 }
  0x35   : > { %p485_p12 = pnand %p483_p8, %p443_p13 }
  0x36   : > { %p492_p7 = por %p491_p5, %p490_p3 }
  0x37   : > { %p486_p0 = pneg %p485_p12 }
  0x39   : > { %p493_p10 = pnand %p492_p7, %p486_p0 }
  0x3b   : > { %496 = shalt.err (!%p493_p10)
}
  0x3c   : > { %390 = dma.hbm_to_vmem [thread:$0]  (!%p672_p11), %s858_s2, 16, %s676_s24, [#allocation6]  }
  0x3d   : > { %p25_p13 = scmp.eq.s32.totalorder %s24_s27, 0  ;;  %s27_s8 = sadd.s32 1, %s593_s14 }
  0x3e   : > { %p34_p9 = scmp.ne.s32.totalorder %s593_s14, %s589_s13  ;;  %p35_p2 = scmp.eq.s32.totalorder %s597_s15, 0 }
  0x3f   : > { %s739_s25 = scalar_select %p25_p13, %s593_s14, %s27_s8  }
  0x40   : > { %p36_p1 = por %p35_p2, %p34_p9  ;;  %p867_p4 = scmp.eq.s32.totalorder %s644_s16, 1 }
  0x41   : > { %p401_p8 = scmp.lt.s32.totalorder %s597_s15, 2  ;;  %s154_s10 = sand.u32 1, %s593_s14  }
  0x42   : > { %p743_p6 = por %p867_p4, %p34_p9  ;;  %s359_s11 = sshll.u32 %s154_s10, 3 }
  0x43   : > { %s360_s17 = sshll.u32 %s597_s15, 7  ;;  %s158_s27 = scalar_lea.vmem [#allocation2], %s359_s11 }
  0x44   : > { %s753_s24 = scalar_lea.hbm %s856_s0, %s360_s17  ;;  %s165_s28 = sshll.u32 %s158_s27, 4  ;;  %s755_s28 = int_to_ptr.vmem [resolvable:$true] %s165_s28 }
  0x45   : > { %p757_p11 = pnand %p401_p8, %p36_p1  ;;  %s155_s30 = scalar_lea.sflag [#allocation3], %s154_s10 }
  0x46   : > { %s497_s4 = scalar_lea.hbm %s753_s24, 128  ;;  %s502_s6 = scalar_lea.hbm %s856_s0, 256 }
  0x47   : > { %p498_p12 = scmp.ne.s32.totalorder %s753_s24, %s497_s4  ;;  %p499_p0 = pneg %p757_p11 }
  0x48   : > { %p503_p7 = scmp.lt.u32.totalorder %s753_s24, %s856_s0  ;;  %p504_p10 = scmp.lt.u32.totalorder %s502_s6, %s497_s4 }
  0x49   : > { %p500_p3 = pnand %p499_p0, %p498_p12  ;;  %p506_p9 = scmp.lt.u32.totalorder %s497_s4, %s753_s24 }
  0x4a   : > { %p505_p13 = por %p504_p10, %p503_p7 }
  0x4b   : > { %p501_p5 = pneg %p500_p3 }
  0x4c   : > { %p507_p2 = por %p506_p9, %p505_p13 }
  0x4e   : > { %p508_p1 = pnand %p507_p2, %p501_p5 }
  0x50   : > { %511 = shalt.err (!%p508_p1)
}
  0x51   : > { %s512_s10 = scalar_lea.vmem %s755_s28, 128  ;;  %s601_s11 = smov [#allocation2]  }
  0x52   : > { %p513_p4 = scmp.ne.s32.totalorder %s755_s28, %s512_s10  ;;  %s517_s17 = sshll.u32 %s601_s11, 4  ;;  %s518_s17 = int_to_ptr.vmem [resolvable:$false] %s517_s17 }
  0x53   : > { %s519_s21 = scalar_lea.vmem %s518_s17, 256  ;;  %p520_p3 = scmp.lt.s32.totalorder %s755_s28, %s518_s17 }
  0x54   : > { %p515_p8 = pnand %p513_p4, %p499_p0  ;;  %p521_p7 = scmp.lt.s32.totalorder %s519_s21, %s512_s10 }
  0x56   : > { %p516_p12 = pneg %p515_p8  ;;  %p522_p10 = por %p521_p7, %p520_p3 }
  0x58   : > { %p523_p13 = pnand %p522_p10, %p516_p12 }
  0x5a   : > { %526 = shalt.err (!%p523_p13)
}
  0x5b   : > { %394 = dma.hbm_to_vmem [thread:$0]  (!%p757_p11), %s753_s24, 128, %s755_s28, %s155_s30  }
  0x5c   : > { %p870_p5 = scmp.ne.s32.totalorder %s865_s20, 0 }
  0x5d   : > { %s789_s23 = sand.u32 (!%p870_p5), 1, %s589_s13   ;;  %p871_p0 = scmp.ne.s32.totalorder (!%p870_p5), %s863_s18, 0 }
  0x5e   : > { %174 = sbr.rel (%p870_p5) target bundleno = 433 (0x1b1), region = 32  ;;  %s362_s27 = sshll.u32 (!%p870_p5), %s789_s23, 3 }
  0x5f   : > { %s177_s4 = scalar_lea.sflag (!%p870_p5), [#allocation3], %s789_s23  ;;  %s180_s22 = scalar_lea.vmem (!%p870_p5), [#allocation2], %s362_s27 }
  0x65   : > { %572 = dma.done.wait (%p871_p0), %s177_s4, 128  }
  0x66   : > { %574 = vsyncadd (%p871_p0), %s177_s4, 4294967168  ;;  %p872_p11 = scmp.eq.s32.totalorder %s644_s16, 0 }
  0x68   : > { %576 = dma.done.wait (%p872_p11), [#allocation6], 32   ;;  %p873_p9 = pmov %p872_p11 }
  0x69   : > { %vm212_vm0 = vcmask 261120   ;;  %v211_v0 = vld [vmem:[%s180_s22] sm:$0xff]  ;;  %v366_v19 = vld [vmem:[#allocation5] ss:$0 sm:$0xff]  ;;  %v367_v21 = vld [vmem:[#allocation7] ss:$0 sm:$0xff] }
  0x6a   : > { %578 = vsyncadd (%p873_p9), [#allocation6], 4294967264  ;;  %v213_v1 = vsel %vm212_vm0, %v211_v0, 0.0  ;;  %s369_s18 = sshll.u32 %s644_s16, 7  ;;  %s210_s20 = scalar_lea.vmem [#allocation8], %s362_s27 }
  0x6b   : > { %221 = vadd.xlane.f32.xlu0 %v213_v1  ;;  %v214_v7 = vrot.slane %v213_v1, 4  ;;  %s265_s24 = sshll.u32 %s210_s20, 4  ;;  %s811_s30 = scalar_lea.hbm %s859_s3, %s369_s18  ;;  %s813_s24 = int_to_ptr.vmem [resolvable:$true] %s265_s24 }
  0x6c   : > { %s252_s5 = scalar_lea.sflag [#allocation4], %s789_s23  ;;  %s527_s6 = scalar_lea.vmem %s813_s24, 128 }
  0x6d   : > { %v215_v8 = vadd.f32 %v214_v7, %v213_v1  ;;  %p528_p2 = scmp.ne.s32.totalorder %s813_s24, %s527_s6  ;;  %s602_s16 = smov [#allocation8]  }
  0x6e   : > { %s531_s7 = sshll.u32 %s602_s16, 4  ;;  %s532_s7 = int_to_ptr.vmem [resolvable:$false] %s531_s7 }
  0x6f   : > { %v216_v9 = vrot.slane %v215_v8, 2  ;;  %p529_p1 = pnand %p528_p2, %p743_p6  ;;  %s533_s8 = scalar_lea.vmem %s532_s7, 256 }
  0x70   : > { %p534_p8 = scmp.lt.s32.totalorder %s813_s24, %s532_s7  ;;  %p535_p12 = scmp.lt.s32.totalorder %s533_s8, %s527_s6 }
  0x71   : > { %v217_v10 = vadd.f32 %v216_v9, %v215_v8  ;;  %p530_p4 = pneg %p529_p1 }
  0x72   : > { %p536_p3 = por %p535_p12, %p534_p8 }
  0x73   : > { %v218_v11 = vrot.slane %v217_v10, 1 }
  0x74   : > { %p537_p7 = pnand %p536_p3, %p530_p4 }
  0x75   : > { %v219_v15 = vadd.f32 %v218_v11, %v217_v10 }
  0x77   : > { %v220_v16 = vmul.f32 0.125, %v219_v15 }
  0x79   : > { %v232_v17 = vsub.f32 %v211_v0, %v220_v16 }
  0xf8   : > { %v222_v2 = vpop.xlane.xlu0 %221 }
  0xf9   : > { %v223_v3 = vmul.f32 0.03125, %v222_v2 }
  0xfb   : > { %v224_v4 = vsub.f32 %v211_v0, %v223_v3 }
  0xfd   : > { %v225_v5 = vmul.f32 %v224_v4, %v224_v4 }
  0xff   : > { %v226_v6 = vsel %vm212_vm0, %v225_v5, 0.0 }
 0x100   : > { %227 = vadd.xlane.f32.xlu0 %v226_v6 }
 0x18d   : > { %v228_v12 = vpop.xlane.xlu0 %227 }
 0x18e   : > { %v229_v13 = vmul.f32 0.032258064, %v228_v12 }
 0x190   : > { %v230_v14 = vadd.f32 1e-05, %v229_v13 }
 0x192   : > { %439 = vrsqrt.f32 %v230_v14 }
 0x19c   : > { %v440_v18 = vpop.eup %439 }
 0x19d   : > { %v233_v20 = vmul.f32 %v440_v18, %v232_v17 }
 0x19f   : > { %v241_v22 = vmul.f32 %v366_v19, %v233_v20 }
 0x1a1   : > { %v249_v23 = vadd.f32 %v367_v21, %v241_v22 }
 0x1a3   : > { %250 = vst.msk [vmem:[%s210_s20] sm:$0xff] %vm212_vm0, %v249_v23 }
 0x1a4   : > { %540 = shalt.err (!%p537_p7)
}
 0x1a5   : > { %s541_s10 = scalar_lea.hbm %s811_s30, 128  ;;  %s545_s21 = scalar_lea.hbm %s859_s3, 256 }
 0x1a6   : > { %p542_p10 = scmp.ne.s32.totalorder %s811_s30, %s541_s10  ;;  %p546_p0 = scmp.lt.u32.totalorder %s811_s30, %s859_s3 }
 0x1a7   : > { %p547_p11 = scmp.lt.u32.totalorder %s545_s21, %s541_s10  ;;  %p549_p2 = scmp.lt.u32.totalorder %s541_s10, %s811_s30 }
 0x1a8   : > { %p543_p13 = pnand %p542_p10, %p743_p6 }
 0x1a9   : > { %p548_p9 = por %p547_p11, %p546_p0 }
 0x1aa   : > { %p544_p5 = pneg %p543_p13 }
 0x1ab   : > { %p550_p1 = por %p549_p2, %p548_p9 }
 0x1ad   : > { %p551_p4 = pnand %p550_p1, %p544_p5 }
 0x1af   : > { %554 = shalt.err (!%p551_p4)
}
 0x1b0   : > { %382 = dma.vmem_to_hbm [thread:$0]  (%p743_p6), %s813_s24, 128, %s811_s30, %s252_s5  }
 0x1b1 PF: > { %s277_s4 = sand.u32 1, %s585_s12   ;;  %p874_p8 = scmp.ne.s32.totalorder %s864_s19, 0 }
 0x1b2   : > { %p875_p12 = scmp.ge.s32.totalorder %s597_s15, 2  ;;  %s278_s22 = scalar_lea.sflag [#allocation4], %s277_s4 }
 0x1b4   : > { %p396_p3 = pnand %p875_p12, %p874_p8 }
 0x1b6   : > { %580 = dma.done.wait (!%p396_p3), %s278_s22, 128  }
 0x1b7   : > { %582 = vsyncadd (!%p396_p3), %s278_s22, 4294967168  ;;  %p17_p7 = scmp.ge.s32.totalorder %s679_s26, 4   ;;  %s876_s12 = smov %s589_s13 }
 0x1b8   : > { %s877_s13 = smov %s593_s14  ;;  %s878_s14 = smov %s739_s25 }
 0x1b9   : > { %s879_s15 = smov %s679_s26  ;;  %19 = sbr.rel (!%p17_p7) target bundleno = 6 (0x6), region = 85 }
 0x1c0   :  { %283 = vsyncpa [#allocation3], 1 }
 0x1c1   :  { %285 = vsyncpa [#allocation3 + $0x1], 1 }
 0x1c2   :  { %286 = vsyncpa [#allocation6], 1 }
 0x1c3   :  { %287 = vsyncpa [#allocation4], 1 }
 0x1c4   :  { %289 = vsyncpa [#allocation4 + $0x1], 1 }

</bundles_post_ra>
